<compile_context>
chip_gen: v7x
topology: tpu7x:2x2x1
jax: 0.10.0
libtpu: 0.0.40
codegen_flags: <defaults>
</compile_context>

<pallas_src>
import functools

import jax
import jax.numpy as jnp
from jax import lax
from jax.experimental import pallas as pl
from jax.experimental.pallas import tpu as pltpu

_EPS = 1e-5
_SLOPE = 0.2
_VMEM_LIMIT = 48 * 1024 * 1024          # safe on v5e/v6e (128 MiB) and v7x (64 MiB physical)
_VMEM_TILE_BUDGET = 40 * 1024 * 1024    # headroom below the scoped limit


def _round_up(x, m):
    return ((x + m - 1) // m) * m


# ------------------ Fused path: conv + InstanceNorm + LeakyReLU in one kernel --------------- #
def _fused_conv_in_lrelu_kernel(p_ref, w_ref, o_ref, *, m_real):
    # p_ref: (1, Mp, Kp)  im2col patches for one batch (zero-padded rows / K columns)
    # w_ref: (Kp, Cp)     conv weight as a matmul matrix (zero-padded)
    # o_ref: (1, Mp, Cp)  normalized + activated output
    # Conv bias intentionally omitted: InstanceNorm2d(affine=False) cancels any
    # per-channel constant, so the bias add is a mathematical no-op.
    y = jnp.dot(p_ref[0], w_ref[...],
                preferred_element_type=jnp.float32,
                precision=lax.Precision.HIGHEST)          # (Mp, Cp), f32 on MXU

    inv_m = jnp.float32(1.0 / m_real)
    mean = jnp.sum(y, axis=0, keepdims=True) * inv_m      # (1, Cp) — zero-pad rows add 0
    var = jnp.sum(y * y, axis=0, keepdims=True) * inv_m - mean * mean
    scale = lax.rsqrt(var + _EPS)                         # EUP slot
    shift = -mean * scale
    z = y * scale + shift
    o_ref[0] = jnp.where(z >= 0.0, z, _SLOPE * z).astype(o_ref.dtype)


# -------------------- Fallback pass 1: conv matmul + streaming channel stats ---------------- #
def _conv_stats_kernel(p_ref, w_ref, y_ref, stats_ref, sum_sc, sq_sc):
    # p_ref:     (1, tm, Kp)  im2col patch tile
    # w_ref:     (Kp, Cp)     conv weight matrix
    # y_ref:     (1, tm, Cp)  pre-norm conv output tile (f32)
    # stats_ref: (1, 2, Cp)   [sum, sum_sq] per channel, written at the last M tile
    # sum_sc/sq_sc: (1, Cp)   f32 accumulators, live across the "arbitrary" M axis
    mi = pl.program_id(1)

    @pl.when(mi == 0)
    def _():
        sum_sc[...] = jnp.zeros_like(sum_sc)
        sq_sc[...] = jnp.zeros_like(sq_sc)

    y = jnp.dot(p_ref[0], w_ref[...],
                preferred_element_type=jnp.float32,
                precision=lax.Precision.HIGHEST)          # (tm, Cp)

    sum_sc[...] += jnp.sum(y, axis=0, keepdims=True)
    sq_sc[...] += jnp.sum(y * y, axis=0, keepdims=True)
    y_ref[0] = y.astype(y_ref.dtype)

    @pl.when(mi == pl.num_programs(1) - 1)
    def _():
        stats_ref[0, 0:1, :] = sum_sc[...]
        stats_ref[0, 1:2, :] = sq_sc[...]


# ----------------------- Fallback pass 2: normalize + LeakyReLU(0.2) ------------------------ #
def _norm_lrelu_kernel(y_ref, stats_ref, o_ref, *, m_real):
    inv_m = jnp.float32(1.0 / m_real)
    s = stats_ref[0, 0:1, :]                   # (1, Cp)
    sq = stats_ref[0, 1:2, :]                  # (1, Cp)
    mean = s * inv_m
    var = sq * inv_m - mean * mean             # biased variance (PyTorch InstanceNorm)
    scale = lax.rsqrt(var + _EPS)
    shift = -mean * scale
    z = y_ref[0].astype(jnp.float32) * scale + shift
    o_ref[0] = jnp.where(z >= 0.0, z, _SLOPE * z).astype(o_ref.dtype)


# -------------------------------------- glue (JAX) ------------------------------------------ #
def _im2col_nhwc(x_nhwc, kh, kw, stride, pad):
    """Extract conv patches. Returns (N, Ho*Wo, kh*kw*C), Ho, Wo."""
    xp = jnp.pad(x_nhwc, ((0, 0), (pad, pad), (pad, pad), (0, 0)))
    n, hp, wp, c = xp.shape
    ho = (hp - kh) // stride + 1
    wo = (wp - kw) // stride + 1
    cols = []
    for i in range(kh):
        for j in range(kw):
            cols.append(
                xp[:, i:i + stride * (ho - 1) + 1:stride,
                      j:j + stride * (wo - 1) + 1:stride, :]
            )
    patches = jnp.stack(cols, axis=-2)                        # (N, Ho, Wo, kh*kw, C)
    return patches.reshape(n, ho * wo, kh * kw * c), ho, wo


def dblock_forward(x_nchw, weight_oihw, bias, stride, *, force_tiled=False, tile_m=None):
    """Pallas implementation of DBlock.forward. Input/output NCHW like PyTorch."""
    # bias accepted for API parity with nn.Conv2d(bias=True) but unused:
    # InstanceNorm2d(affine=False) cancels a per-channel constant exactly.
    del bias
    n, cin, h, w = x_nchw.shape
    cout, cin_w, kh, kw = weight_oihw.shape
    assert cin == cin_w and kh == 4 and kw == 4

    x_nhwc = jnp.transpose(x_nchw, (0, 2, 3, 1))
    # TODO(synk): fold patch extraction into the kernel (overlapping manual-DMA windows
    # on the raw NHWC feature map) to avoid the kh*kw HBM expansion of im2col.
    patches, ho, wo = _im2col_nhwc(x_nhwc, kh, kw, stride, pad=1)
    m = ho * wo
    k = kh * kw * cin

    # Lane-dense / MXU-friendly padding.
    kp = _round_up(k, 128)
    cp = _round_up(cout, 128)
    itemsize = 4

    # (Cout, Cin, KH, KW) -> (KH, KW, Cin, Cout) -> (K, Cout); matches im2col K order.
    w_mat = jnp.transpose(weight_oihw, (2, 3, 1, 0)).reshape(k, cout)
    w_mat = jnp.pad(w_mat.astype(jnp.float32), ((0, kp - k), (0, cp - cout)))

    # ---------------- Fused single-pass path (whole feature map per batch fits VMEM) --------
    m8 = _round_up(m, 8)
    fused_bytes = 2 * (m8 * kp + m8 * cp) * itemsize + 2 * kp * cp * itemsize
    if not force_tiled and fused_bytes <= _VMEM_TILE_BUDGET:
        patches_p = jnp.pad(patches.astype(jnp.float32),
                            ((0, 0), (0, m8 - m), (0, kp - k)))
        out_p = pl.pallas_call(
            functools.partial(_fused_conv_in_lrelu_kernel, m_real=m),
            out_shape=jax.ShapeDtypeStruct((n, m8, cp), x_nchw.dtype),
            grid_spec=pltpu.PrefetchScalarGridSpec(
                num_scalar_prefetch=0,
                grid=(n,),
                in_specs=[
                    pl.BlockSpec((1, m8, kp), lambda b: (b, 0, 0)),
                    pl.BlockSpec((kp, cp), lambda b: (0, 0)),
                ],
                out_specs=pl.BlockSpec((1, m8, cp), lambda b: (b, 0, 0)),
            ),
            compiler_params=pltpu.CompilerParams(
                dimension_semantics=("parallel",),
                vmem_limit_bytes=_VMEM_LIMIT,
            ),
        )(patches_p, w_mat)
        out = out_p[:, :m, :cout].reshape(n, ho, wo, cout)
        return jnp.transpose(out, (0, 3, 1, 2))

    # ---------------- Tiled two-pass path (large feature maps) ------------------------------
    # Tile the M = Ho*Wo axis; tm multiple of 8, sized against a VMEM budget
    # (double-buffered in/out tiles + double-buffered weight).
    if tile_m is None:
        fixed = 2 * kp * cp * itemsize
        avail = max(_VMEM_TILE_BUDGET - fixed, 1 << 20)
        tm = max(8, min(512, (avail // (2 * (kp + cp) * itemsize)) // 8 * 8))
    else:
        tm = max(8, _round_up(tile_m, 8))
    tm = min(tm, _round_up(m, 8))
    m_pad = _round_up(m, tm)
    n_mt = m_pad // tm

    patches_p = jnp.pad(patches.astype(jnp.float32),
                        ((0, 0), (0, m_pad - m), (0, kp - k)))

    # Pass 1: conv matmul + per-channel streaming stats.
    y, stats = pl.pallas_call(
        _conv_stats_kernel,
        out_shape=(
            jax.ShapeDtypeStruct((n, m_pad, cp), jnp.float32),
            jax.ShapeDtypeStruct((n, 2, cp), jnp.float32),
        ),
        grid_spec=pltpu.PrefetchScalarGridSpec(
            num_scalar_prefetch=0,
            grid=(n, n_mt),
            in_specs=[
                pl.BlockSpec((1, tm, kp), lambda b, mi: (b, mi, 0)),
                pl.BlockSpec((kp, cp), lambda b, mi: (0, 0)),
            ],
            out_specs=[
                pl.BlockSpec((1, tm, cp), lambda b, mi: (b, mi, 0)),
                pl.BlockSpec((1, 2, cp), lambda b, mi: (b, 0, 0)),
            ],
            scratch_shapes=[
                pltpu.VMEM((1, cp), jnp.float32),
                pltpu.VMEM((1, cp), jnp.float32),
            ],
        ),
        compiler_params=pltpu.CompilerParams(
            dimension_semantics=("parallel", "arbitrary"),
            vmem_limit_bytes=_VMEM_LIMIT,
        ),
    )(patches_p, w_mat)

    # Pass 2: normalize + LeakyReLU (fully parallel grid).
    out_p = pl.pallas_call(
        functools.partial(_norm_lrelu_kernel, m_real=m),
        out_shape=jax.ShapeDtypeStruct((n, m_pad, cp), x_nchw.dtype),
        grid_spec=pltpu.PrefetchScalarGridSpec(
            num_scalar_prefetch=0,
            grid=(n, n_mt),
            in_specs=[
                pl.BlockSpec((1, tm, cp), lambda b, mi: (b, mi, 0)),
                pl.BlockSpec((1, 2, cp), lambda b, mi: (b, 0, 0)),
            ],
            out_specs=pl.BlockSpec((1, tm, cp), lambda b, mi: (b, mi, 0)),
        ),
        compiler_params=pltpu.CompilerParams(
            dimension_semantics=("parallel", "parallel"),
            vmem_limit_bytes=_VMEM_LIMIT,
        ),
    )(y, stats)

    out = out_p[:, :m, :cout].reshape(n, ho, wo, cout)
    return jnp.transpose(out, (0, 3, 1, 2))


# ------------------------------------ pure-JAX reference ------------------------------------ #
def _reference(x_nchw, weight_oihw, bias, stride):
    y = lax.conv_general_dilated(
        x_nchw, weight_oihw, window_strides=(stride, stride),
        padding=((1, 1), (1, 1)),
        dimension_numbers=("NCHW", "OIHW", "NCHW"),
        precision=lax.Precision.HIGHEST,
    )
    y = y + bias[None, :, None, None]
    mean = jnp.mean(y, axis=(2, 3), keepdims=True)
    var = jnp.mean(jnp.square(y - mean), axis=(2, 3), keepdims=True)
    y = (y - mean) * lax.rsqrt(var + _EPS)
    return jnp.where(y >= 0.0, y, _SLOPE * y)


# --------------------------------------------- main ----------------------------------------- #
if __name__ == "__main__":
    N, CIN, COUT, H, W, STRIDE = 2, 4, 8, 16, 16, 2

    key = jax.random.PRNGKey(0)
    kx, kw_, kb = jax.random.split(key, 3)

    x = jax.random.normal(kx, (N, CIN, H, W), dtype=jnp.float32)

    # Deterministic PyTorch-style init: U(-bound, bound), bound = 1/sqrt(fan_in)
    fan_in = CIN * 4 * 4
    bound = 1.0 / (fan_in ** 0.5)
    weight = jax.random.uniform(kw_, (COUT, CIN, 4, 4), jnp.float32, -bound, bound)
    bias = jax.random.uniform(kb, (COUT,), jnp.float32, -bound, bound)

    ref = jax.block_until_ready(_reference(x, weight, bias, STRIDE))
    ho = (H + 2 - 4) // STRIDE + 1
    wo = (W + 2 - 4) // STRIDE + 1
    assert ref.shape == (N, COUT, ho, wo)

    # Fused single-pass path (default for these shapes).
    out_fused = jax.block_until_ready(dblock_forward(x, weight, bias, STRIDE))
    assert out_fused.shape == ref.shape
    err_fused = float(jnp.max(jnp.abs(out_fused - ref)))
    assert err_fused < 5e-4, err_fused

    # Tiled two-pass streaming path (forced, with multiple M tiles) to validate the fallback.
    out_tiled = jax.block_until_ready(
        dblock_forward(x, weight, bias, STRIDE, force_tiled=True, tile_m=16))
    assert out_tiled.shape == ref.shape
    err_tiled = float(jnp.max(jnp.abs(out_tiled - ref)))
    assert err_tiled < 5e-4, err_tiled

    print("KERNEL_OK")
</pallas_src>

<mosaic_0001>
module attributes {stable_mosaic.version = 11 : i64} {
  func.func @_fused_conv_in_lrelu_kernel(%arg0: i32, %arg1: memref<1x64x128xf32, #tpu.memory_space<vmem>>, %arg2: memref<128x128xf32, #tpu.memory_space<vmem>>, %arg3: memref<1x64x128xf32, #tpu.memory_space<vmem>>) attributes {dimension_semantics = [#tpu.dimension_semantics<parallel>], iteration_bounds = array<i64: 2>, scalar_prefetch = 0 : i64, scratch_operands = 0 : i64, tpu.core_type = #tpu.core_type<tc>, window_params = [{transform_indices = @transform_0, window_bounds = array<i64: 1, 64, 128>}, {pipeline_mode = #tpu.pipeline_mode<synchronous>, transform_indices = @transform_1, window_bounds = array<i64: 128, 128>}, {transform_indices = @transform_2, window_bounds = array<i64: 1, 64, 128>}]} {
    %c0 = arith.constant 0 : index
    %c0_0 = arith.constant 0 : index
    %c0_1 = arith.constant 0 : index
    %0 = vector.load %arg1[%c0, %c0_0, %c0_1] : memref<1x64x128xf32, #tpu.memory_space<vmem>>, vector<1x64x128xf32>
    %1 = vector.shape_cast %0 : vector<1x64x128xf32> to vector<64x128xf32>
    %c0_2 = arith.constant 0 : index
    %c0_3 = arith.constant 0 : index
    %2 = vector.load %arg2[%c0_2, %c0_3] : memref<128x128xf32, #tpu.memory_space<vmem>>, vector<128x128xf32>
    %cst = arith.constant dense<0.000000e+00> : vector<64x128xf32>
    %3 = tpu.matmul %1, %2, %cst {dimension_numbers = #tpu.dot_dimension_numbers<[1], [0], [0], [1], [0, 0, 1, 1], [], []>, precision = #tpu.contract_precision<fp32>} : vector<64x128xf32>, vector<128x128xf32>, vector<64x128xf32> -> vector<64x128xf32>
    %cst_4 = arith.constant dense<0.000000e+00> : vector<128xf32>
    %4 = vector.multi_reduction <add>, %3, %cst_4 [0] : vector<64x128xf32> to vector<128xf32>
    %5 = vector.shape_cast %4 : vector<128xf32> to vector<1x128xf32>
    %cst_5 = arith.constant 1.562500e-02 : f32
    %6 = vector.broadcast %cst_5 : f32 to vector<1x128xf32>
    %7 = arith.mulf %5, %6 : vector<1x128xf32>
    %8 = arith.mulf %3, %3 : vector<64x128xf32>
    %cst_6 = arith.constant dense<0.000000e+00> : vector<128xf32>
    %9 = vector.multi_reduction <add>, %8, %cst_6 [0] : vector<64x128xf32> to vector<128xf32>
    %10 = vector.shape_cast %9 : vector<128xf32> to vector<1x128xf32>
    %cst_7 = arith.constant 1.562500e-02 : f32
    %11 = vector.broadcast %cst_7 : f32 to vector<1x128xf32>
    %12 = arith.mulf %10, %11 : vector<1x128xf32>
    %13 = arith.mulf %7, %7 : vector<1x128xf32>
    %14 = arith.subf %12, %13 : vector<1x128xf32>
    %cst_8 = arith.constant 9.99999974E-6 : f32
    %15 = vector.broadcast %cst_8 : f32 to vector<1x128xf32>
    %16 = arith.addf %14, %15 : vector<1x128xf32>
    %17 = math.rsqrt %16 : vector<1x128xf32>
    %cst_9 = arith.constant 0.000000e+00 : f32
    %18 = vector.broadcast %cst_9 : f32 to vector<1x128xf32>
    %19 = arith.subf %18, %7 : vector<1x128xf32>
    %20 = arith.mulf %19, %17 : vector<1x128xf32>
    %21 = vector.broadcast %17 : vector<1x128xf32> to vector<64x128xf32>
    %22 = arith.mulf %3, %21 : vector<64x128xf32>
    %23 = vector.broadcast %20 : vector<1x128xf32> to vector<64x128xf32>
    %24 = arith.addf %22, %23 : vector<64x128xf32>
    %cst_10 = arith.constant 0.000000e+00 : f32
    %25 = vector.broadcast %cst_10 : f32 to vector<64x128xf32>
    %26 = arith.cmpf oge, %24, %25 : vector<64x128xf32>
    %cst_11 = arith.constant 2.000000e-01 : f32
    %27 = vector.broadcast %cst_11 : f32 to vector<64x128xf32>
    %28 = arith.mulf %27, %24 : vector<64x128xf32>
    %29 = arith.select %26, %24, %28 : vector<64x128xi1>, vector<64x128xf32>
    %c0_12 = arith.constant 0 : index
    %c0_13 = arith.constant 0 : index
    %c0_14 = arith.constant 0 : index
    %30 = vector.load %arg3[%c0_12, %c0_13, %c0_14] : memref<1x64x128xf32, #tpu.memory_space<vmem>>, vector<1x64x128xf32>
    %31 = vector.shape_cast %30 : vector<1x64x128xf32> to vector<64x128xf32>
    %32 = vector.shape_cast %29 : vector<64x128xf32> to vector<1x64x128xf32>
    tpu.vector_store %arg3[%c0_12, %c0_13, %c0_14], %32 {strides = array<i32>} : memref<1x64x128xf32, #tpu.memory_space<vmem>>, vector<1x64x128xf32>,
    return
  }
  func.func @transform_0(%arg0: i32) -> (i32, i32, i32) {
    %c0_i32 = arith.constant 0 : i32
    %c0_i32_0 = arith.constant 0 : i32
    %c0_i32_1 = arith.constant 0 : i32
    return %arg0, %c0_i32, %c0_i32_0 : i32, i32, i32
  }
  func.func @transform_1(%arg0: i32) -> (i32, i32) {
    %c0_i32 = arith.constant 0 : i32
    %c0_i32_0 = arith.constant 0 : i32
    %c0_i32_1 = arith.constant 0 : i32
    return %c0_i32, %c0_i32_0 : i32, i32
  }
  func.func @transform_2(%arg0: i32) -> (i32, i32, i32) {
    %c0_i32 = arith.constant 0 : i32
    %c0_i32_0 = arith.constant 0 : i32
    %c0_i32_1 = arith.constant 0 : i32
    return %arg0, %c0_i32, %c0_i32_0 : i32, i32, i32
  }
}

</mosaic_0001>

<bundles_post_ra>
// kernel: tpu_custom_call.1
= control target key start
LH: loop header
LB: loop body
LE: loop exit
PB: predicated region body
PF: predicated region fallthrough
CT: control target
= control target key end

     0   :  { %7 = vsyncpa [#allocation3], 0  ;;  %s2788_s0 = inlined_call_operand.hbm [shape: f32[2,64,128], index: 0, kind: input, shape index: {}]   ;;  %s2789_s1 = inlined_call_operand.hbm [shape: f32[128,128], index: 1, kind: input, shape index: {}]   ;;  %s2790_s2 = inlined_call_operand.hbm [shape: f32[2,64,128], index: 2, kind: output, shape index: {}]  }
   0x1   :  { %9 = vsyncpa [#allocation3 + $0x1], 0 }
   0x2   :  { %10 = vsyncpa [#allocation6], 0 }
   0x3   :  { %11 = vsyncpa [#allocation4], 0 }
   0x4   :  { %13 = vsyncpa [#allocation4 + $0x1], 0  ;;  %s2203_s9 = smov 0   ;;  %s2205_s10 = smov 0  }
   0x5   :  { %s2207_s11 = smov 0   ;;  %s2209_s12 = smov 0  }
   0x6 LB: > { %s2224_s13 = sadd.s32 4294967295, %s2179_s12   ;;  %s1330_s14 = sadd.s32 4294967294, %s2179_s12   ;;  %s2179_s12 = sphi %s2209_s12, %s2855_s12   ;;  %s2175_s11 = sphi %s2207_s11, %s2854_s11   ;;  %s2171_s10 = sphi %s2205_s10, %s2853_s10   ;;  %s2167_s9 = sphi %s2203_s9, %s2852_s9  }
   0x7   : > { %p39_p0 = scmp.ne.s32.totalorder %s2171_s10, %s2167_s9  ;;  %p2791_p1 = scmp.eq.s32.totalorder %s2224_s13, 0 }
   0x8   : > { %p90_p3 = scmp.eq.s32.totalorder %s1330_s14, 1  ;;  %p1331_p5 = scmp.ge.s32.totalorder %s2179_s12, 1 }
   0x9   : > { %p2233_p4 = por %p2791_p1, %p39_p0  ;;  %p97_p7 = scmp.lt.s32.totalorder %s2179_s12, 3 }
   0xa   : > { %p2238_p6 = por %p90_p3, %p39_p0  ;;  %s2181_s18 = smov [#allocation5]  }
   0xb   : > { %s2813_s15 = scalar_select %p2233_p4, 1, 0 }
   0xc   : > { %s2814_s16 = scalar_select %p2238_p6, 1, 0 }
   0xd   : > { %p2243_p8 = pnand %p1331_p5, %p97_p7  ;;  %s109_s19 = sshll.u32 %s2181_s18, 4  ;;  %s2247_s19 = int_to_ptr.vmem [resolvable:$true] %s109_s19 }
   0xe   : > { %s2259_s21 = sadd.s32 1, %s2179_s12   ;;  %s26_s22 = sadd.s32 1, %s2175_s11 }
   0xf   : > { %s2815_s17 = scalar_select %p2243_p8, 1, 0 }
  0x10   : > { %p1996_p9 = pneg %p2243_p8  ;;  %s23_s23 = ssub.s32 %s2179_s12, %s2259_s21 }
  0x11   : > { %s2051_s26 = scalar_lea.hbm %s2789_s1, 2048 }
  0x12   : > { %p2254_p11 = pnand %p1996_p9, %p2791_p1  ;;  %p2052_p12 = scmp.ne.s32.totalorder %s2789_s1, %s2051_s26 }
  0x13   : > { %p2058_p5 = scmp.lt.u32.totalorder %s2051_s26, %s2789_s1 }
  0x14   : > { %p2053_p13 = pneg %p2254_p11 }
  0x16   : > { %p2054_p0 = pnand %p2053_p13, %p2052_p12 }
  0x18   : > { %p2055_p3 = pneg %p2054_p0 }
  0x1a   : > { %p2060_p7 = pnand %p2058_p5, %p2055_p3 }
  0x1c   : > { %2063 = shalt.err (!%p2060_p7)
}
  0x1d   : > { %s2064_s3 = scalar_lea.vmem %s2247_s19, 2048  ;;  %p2072_p2 = scmp.lt.s32.totalorder %s2247_s19, %s2247_s19 }
  0x1e   : > { %p2065_p9 = scmp.ne.s32.totalorder %s2247_s19, %s2064_s3  ;;  %p2073_p6 = scmp.lt.s32.totalorder %s2064_s3, %s2064_s3 }
  0x20   : > { %p2067_p10 = pnand %p2065_p9, %p2053_p13  ;;  %p2074_p4 = por %p2073_p6, %p2072_p2 }
  0x22   : > { %p2068_p1 = pneg %p2067_p10 }
  0x24   : > { %p2075_p8 = pnand %p2074_p4, %p2068_p1 }
  0x26   : > { %2078 = shalt.err (!%p2075_p8)
}
  0x27   : > { %s2182_s4 = smov 128   ;;  %s2183_s5 = smov 8  }
  0x28   : > { %1999 = dma.hbm_to_vmem [thread:$0]  (!%p2254_p11), %s2789_s1, 2048, %s2247_s19, [#allocation6], %s2182_s4, %s2182_s4, %s2183_s5  }
  0x29   : > { %p24_p1 = scmp.eq.s32.totalorder %s23_s23, 0  ;;  %p33_p2 = scmp.ne.s32.totalorder %s2175_s11, %s2171_s10 }
  0x2a   : > { %p34_p4 = scmp.eq.s32.totalorder %s2179_s12, 0  ;;  %p2009_p6 = scmp.lt.s32.totalorder %s2179_s12, 2 }
  0x2b   : > { %s2293_s8 = scalar_select %p24_p1, %s2175_s11, %s26_s22  }
  0x2c   : > { %p35_p8 = por %p34_p4, %p33_p2  ;;  %p2817_p10 = scmp.eq.s32.totalorder %s2224_s13, 1 }
  0x2d   : > { %s123_s18 = sand.u32 1, %s2175_s11   ;;  %s1346_s20 = sshll.u32 %s2179_s12, 10 }
  0x2e   : > { %p2297_p12 = por %p2817_p10, %p33_p2  ;;  %s1334_s24 = sshll.u32 %s123_s18, 6 }
  0x2f   : > { %s2306_s27 = scalar_lea.hbm %s2788_s0, %s1346_s20  ;;  %s127_s19 = scalar_lea.vmem [#allocation2], %s1334_s24 }
  0x30   : > { %s134_s22 = sshll.u32 %s127_s19, 4  ;;  %p2308_p11 = pnand %p2009_p6, %p35_p8  ;;  %s2312_s22 = int_to_ptr.vmem [resolvable:$true] %s134_s22 }
  0x31   : > { %s2314_s28 = scalar_lea.sflag [#allocation3], %s123_s18  ;;  %s2079_s29 = scalar_lea.hbm %s2306_s27, 1024 }
  0x32   : > { %p2080_p13 = scmp.ne.s32.totalorder %s2306_s27, %s2079_s29  ;;  %p2081_p0 = pneg %p2308_p11 }
  0x33   : > { %s2084_s6 = scalar_lea.hbm %s2788_s0, 2048  ;;  %p2085_p7 = scmp.lt.u32.totalorder %s2306_s27, %s2788_s0 }
  0x34   : > { %p2082_p3 = pnand %p2081_p0, %p2080_p13  ;;  %p2086_p9 = scmp.lt.u32.totalorder %s2084_s6, %s2079_s29 }
  0x35   : > { %p2088_p2 = scmp.lt.u32.totalorder %s2079_s29, %s2306_s27 }
  0x36   : > { %p2083_p5 = pneg %p2082_p3  ;;  %p2087_p1 = por %p2086_p9, %p2085_p7 }
  0x38   : > { %p2089_p4 = por %p2088_p2, %p2087_p1 }
  0x3a   : > { %p2090_p6 = pnand %p2089_p4, %p2083_p5 }
  0x3c   : > { %2093 = shalt.err (!%p2090_p6)
}
  0x3d   : > { %s2094_s18 = scalar_lea.vmem %s2312_s22, 1024  ;;  %s2184_s24 = smov [#allocation2]  }
  0x3e   : > { %p2095_p8 = scmp.ne.s32.totalorder %s2312_s22, %s2094_s18  ;;  %s2099_s25 = sshll.u32 %s2184_s24, 4  ;;  %s2100_s25 = int_to_ptr.vmem [resolvable:$false] %s2099_s25 }
  0x3f   : > { %s2101_s26 = scalar_lea.vmem %s2100_s25, 2048  ;;  %p2102_p3 = scmp.lt.s32.totalorder %s2312_s22, %s2100_s25 }
  0x40   : > { %p2097_p10 = pnand %p2095_p8, %p2081_p0  ;;  %p2103_p7 = scmp.lt.s32.totalorder %s2101_s26, %s2094_s18 }
  0x42   : > { %p2098_p13 = pneg %p2097_p10  ;;  %p2104_p9 = por %p2103_p7, %p2102_p3 }
  0x44   : > { %p2105_p1 = pnand %p2104_p9, %p2098_p13 }
  0x46   : > { %2108 = shalt.err (!%p2105_p1)
}
  0x47   : > { %2003 = dma.hbm_to_vmem [thread:$0]  (!%p2308_p11), %s2306_s27, 1024, %s2312_s22, %s2314_s28, %s2182_s4, %s2182_s4, %s2183_s5  }
  0x48   : > { %p2820_p0 = scmp.ne.s32.totalorder %s2815_s17, 0 }
  0x4a   : > { %146 = sbr.rel (%p2820_p0) target bundleno = 478 (0x1de), region = 28 }
  0x51   : > { %s2348_s19 = sand.u32 1, %s2171_s10   ;;  %p2821_p5 = scmp.ne.s32.totalorder %s2813_s15, 0 }
  0x52   : > { %s1338_s29 = sshll.u32 %s2348_s19, 6  ;;  %s149_s30 = scalar_lea.sflag [#allocation3], %s2348_s19 }
  0x53   : > { %s2354_s23 = scalar_lea.vmem [#allocation2], %s1338_s29 }
  0x54   : > { %2154 = dma.done.wait (%p2821_p5), %s149_s30, 1024  }
  0x55   : > { %2156 = vsyncadd (%p2821_p5), %s149_s30, 4294966272  ;;  %p2822_p11 = scmp.eq.s32.totalorder %s2224_s13, 0 }
  0x57   : > { %2158 = dma.done.wait (%p2822_p11), [#allocation6], 2048   ;;  %p2823_p2 = pmov %p2822_p11 }
  0x58   : > { %v185_v0 = vld [vmem:[#allocation5] sm:$0xff]  ;;  %v186_v1 = vld [vmem:[#allocation5 + $0x8] sm:$0xff]  ;;  %v187_v2 = vld [vmem:[#allocation5 + $0x10] sm:$0xff]  ;;  %s1347_s15 = sshll.u32 %s2224_s13, 10  ;;  %s2728_s17 = scalar_lea.vmem [#allocation7], %s1338_s29 }
  0x59   : > { %2160 = vsyncadd (%p2823_p2), [#allocation6], 4294965248  ;;  %v202_v3 = vand.u32 4294901760, %v185_v0  ;;  %v205_v4 = vand.u32 4294901760, %v186_v1  ;;  %v188_v5 = vld [vmem:[#allocation5 + $0x18] sm:$0xff]  ;;  %v208_v6 = vand.u32 4294901760, %v187_v2  ;;  %s2735_s27 = scalar_lea.hbm %s2790_s2, %s1347_s15 }
  0x5a   : > { %v2364_v7 = vld [vmem:[#allocation5 + $0x20] sm:$0xff]  ;;  %v2366_v8 = vld [vmem:[#allocation5 + $0x28] sm:$0xff]  ;;  %v211_v9 = vand.u32 4294901760, %v188_v5  ;;  %v2374_v14 = vld [vmem:[#allocation5 + $0x30] sm:$0xff]  ;;  %s1247_s4 = sshll.u32 %s2728_s17, 4  ;;  %s1234_s22 = scalar_lea.sflag [#allocation4], %s2348_s19  ;;  %s2737_s4 = int_to_ptr.vmem [resolvable:$true] %s1247_s4 }
  0x5b   : > { %v2368_v10 = vpack.c.bf16 %v205_v4, %v202_v3  ;;  %v214_v11 = vand.u32 4294901760, %v2364_v7  ;;  %v217_v12 = vand.u32 4294901760, %v2366_v8  ;;  %v2376_v15 = vld [vmem:[#allocation5 + $0x38] sm:$0xff]  ;;  %v177_v16 = vld [vmem:[%s2354_s23] sm:$0xff]  ;;  %v220_v19 = vand.u32 4294901760, %v2374_v14  ;;  %v2395_v22 = vld [vmem:[#allocation5 + $0x48] sm:$0xff] }
  0x5c   : > { %v2372_v13 = vpack.c.bf16 %v211_v9, %v208_v6  ;;  %v2383_v17 = vand.u32 4294901760, %v177_v16  ;;  %v223_v20 = vand.u32 4294901760, %v2376_v15  ;;  %v2393_v21 = vld [vmem:[#allocation5 + $0x40] sm:$0xff]  ;;  %v178_v25 = vld [vmem:[%s2354_s23 + $0x8] sm:$0xff]  ;;  %v229_v28 = vand.u32 4294901760, %v2395_v22  ;;  %v2414_v29 = vld [vmem:[#allocation5 + $0x50] sm:$0xff] }
  0x5d   : > { %1757 = vmatprep.subr.bf16.mxu1 %v2368_v10  ;;  %1853 = vmatprep.subr.bf16.mxu0 %v2368_v10  ;;  %v2389_v18 = vpack.c.bf16 %v217_v12, %v214_v11  ;;  %v226_v27 = vand.u32 4294901760, %v2393_v21  ;;  %v2416_v30 = vld [vmem:[#allocation5 + $0x58] sm:$0xff]  ;;  %v2419_v32 = vand.u32 4294901760, %v178_v25  ;;  %v2423_v34 = vsub.f32 %v185_v0, %v202_v3  ;;  %v2435_v38 = vld [vmem:[#allocation5 + $0x60] sm:$0xff]  ;;  %v2437_v39 = vld [vmem:[#allocation5 + $0x68] sm:$0xff]  ;;  %s2109_s28 = scalar_lea.vmem %s2737_s4, 1024 }
  0x5e   : > { %1759 = vmatpush3.bf16.msra.mxu1 %v2368_v10  ;;  %1855 = vmatpush3.bf16.msra.mxu0 %v2368_v10  ;;  %v2398_v23 = vsub.f32 %v177_v16, %v2383_v17  ;;  %v2410_v26 = vpack.c.bf16 %v223_v20, %v220_v19  ;;  %v232_v36 = vand.u32 4294901760, %v2414_v29  ;;  %v235_v37 = vand.u32 4294901760, %v2416_v30  ;;  %v2441_v41 = vld [vmem:[#allocation5 + $0x70] sm:$0xff]  ;;  %v2443_v42 = vld [vmem:[#allocation5 + $0x78] sm:$0xff]  ;;  %v181_v59 = vld [vmem:[%s2354_s23 + $0x20] sm:$0xff]  ;;  %p2110_p4 = scmp.ne.s32.totalorder %s2737_s4, %s2109_s28  ;;  %s2185_s3 = smov [#allocation7]  }
  0x5f   : > { %1761 = vmatprep.subr.bf16.mxu1 %v2372_v13  ;;  %1857 = vmatprep.subr.bf16.mxu0 %v2372_v13  ;;  %v2431_v35 = vpack.c.bf16 %v229_v28, %v226_v27  ;;  %v2439_v40 = vsub.f32 %v186_v1, %v205_v4  ;;  %v2446_v43 = vsub.f32 %v178_v25, %v2419_v32  ;;  %v179_v45 = vld [vmem:[%s2354_s23 + $0x10] sm:$0xff]  ;;  %v2797_v46 = vand.u32 4294901760, %v2435_v38  ;;  %v180_v56 = vld [vmem:[%s2354_s23 + $0x18] sm:$0xff]  ;;  %s2113_s6 = sshll.u32 %s2185_s3, 4  ;;  %s2114_s6 = int_to_ptr.vmem [resolvable:$false] %s2113_s6 }
  0x60   : > { %2824 = vst [vmem:[#allocation11_spill] sm:$0xff] %v2398_v23  ;;  %v284_v24 = vand.u32 4294901760, %v2398_v23  ;;  %v2448_v44 = vsub.f32 %v187_v2, %v208_v6  ;;  %v2796_v47 = vand.u32 4294901760, %v2437_v39  ;;  %v365_v48 = vand.u32 4294901760, %v2423_v34  ;;  %v182_v6 = vld [vmem:[%s2354_s23 + $0x28] sm:$0xff]  ;;  %p2111_p6 = pnand %p2110_p4, %p2297_p12  ;;  %s2115_s7 = scalar_lea.vmem %s2114_s6, 2048 }
  0x61   : > { %2825 = vst [vmem:[#allocation12_spill] sm:$0xff] %v2431_v35  ;;  %v2456_v49 = vsub.f32 %v188_v5, %v211_v9  ;;  %v2464_v50 = vpack.c.bf16 %v235_v37, %v232_v36  ;;  %v372_v51 = vand.u32 4294901760, %v2439_v40  ;;  %v2468_v52 = vsub.f32 %v2364_v7, %v214_v11  ;;  %p2116_p10 = scmp.lt.s32.totalorder %s2737_s4, %s2114_s6  ;;  %p2117_p13 = scmp.lt.s32.totalorder %s2115_s7, %s2109_s28 }
  0x62   : > { %1763 = vmatpush3.bf16.msra.mxu1 %v2372_v13  ;;  %1859 = vmatpush3.bf16.msra.mxu0 %v2372_v13  ;;  %v285_v31 = vsub.f32 %v2398_v23, %v284_v24  ;;  %v2795_v53 = vand.u32 4294901760, %v2441_v41  ;;  %v2794_v54 = vand.u32 4294901760, %v2443_v42  ;;  %v2472_v55 = vand.u32 4294901760, %v179_v45  ;;  %p2112_p8 = pneg %p2111_p6 }
  0x63   : > { %1765 = vmatprep.subr.bf16.mxu1 %v2389_v18  ;;  %1861 = vmatprep.subr.bf16.mxu0 %v2389_v18  ;;  %2826 = vst [vmem:[#allocation13_spill] sm:$0xff] %v2464_v50  ;;  %v2798_v57 = vand.u32 4294901760, %v2446_v43  ;;  %v379_v58 = vand.u32 4294901760, %v2448_v44  ;;  %v2484_v60 = vpack.c.bf16 %v2796_v47, %v2797_v46  ;;  %v366_v61 = vsub.f32 %v2423_v34, %v365_v48  ;;  %p2118_p3 = por %p2117_p13, %p2116_p10 }
  0x64   : > { %1656 = vmatprep.mubr.f32.mxu0 %v284_v24  ;;  %v286_v33 = vand.u32 4294901760, %v285_v31  ;;  %v386_v62 = vand.u32 4294901760, %v2456_v49  ;;  %v373_v63 = vsub.f32 %v2439_v40, %v372_v51  ;;  %v2799_v0 = vand.u32 4294901760, %v2468_v52 }
  0x65   : > { %2827 = vst [vmem:[#allocation14_spill] sm:$0xff] %v2484_v60  ;;  %v2495_v1 = vsub.f32 %v2366_v8, %v217_v12  ;;  %v2497_v2 = vand.u32 4294901760, %v180_v56  ;;  %v2503_v3 = vpack.c.bf16 %v2794_v54, %v2795_v53  ;;  %v2506_v4 = vsub.f32 %v179_v45, %v2472_v55  ;;  %v183_v12 = vld [vmem:[%s2354_s23 + $0x30] sm:$0xff]  ;;  %p2119_p7 = pnand %p2118_p3, %p2112_p8 }
  0x66   : > { %1767 = vmatpush3.bf16.msra.mxu1 %v2389_v18  ;;  %1863 = vmatpush3.bf16.msra.mxu0 %v2389_v18  ;;  %v2508_v5 = vand.u32 4294901760, %v181_v59  ;;  %v2511_v7 = vpack.c.bf16 %v372_v51, %v365_v48  ;;  %v295_v8 = vsub.f32 %v2446_v43, %v2798_v57  ;;  %v380_v9 = vsub.f32 %v2448_v44, %v379_v58 }
  0x67   : > { %1769 = vmatprep.subr.bf16.mxu1 %v2410_v26  ;;  %1865 = vmatprep.subr.bf16.mxu0 %v2410_v26  ;;  %2828 = vst [vmem:[#allocation15_spill] sm:$0xff] %v2503_v3  ;;  %2829 = vst [vmem:[#allocation16_spill] sm:$0xff] %v2506_v4  ;;  %v2520_v11 = vsub.f32 %v2374_v14, %v220_v19  ;;  %v367_v16 = vand.u32 4294901760, %v366_v61  ;;  %v387_v24 = vsub.f32 %v2456_v49, %v386_v62 }
  0x68   : > { %1524 = vmatprep.mubr.f32.mxu1 %v286_v33  ;;  %v2529_v25 = vsub.f32 %v2376_v15, %v223_v20  ;;  %v2532_v31 = vsub.f32 %v180_v56, %v2497_v2  ;;  %v374_v14 = vand.u32 4294901760, %v373_v63  ;;  %v2539_v19 = vsub.f32 %v2468_v52, %v2799_v0 }
  0x69   : > { %v400_v33 = vand.u32 4294901760, %v2495_v1  ;;  %v2542_v45 = vand.u32 4294901760, %v182_v6  ;;  %v2547_v15 = vsub.f32 %v2393_v21, %v226_v27  ;;  %v304_v20 = vand.u32 4294901760, %v2506_v4 }
  0x6a   : > { %1771 = vmatpush3.bf16.msra.mxu1 %v2410_v26  ;;  %1867 = vmatpush3.bf16.msra.mxu0 %v2410_v26  ;;  %2830 = vst [vmem:[#allocation17_spill] sm:$0xff] %v2532_v31  ;;  %v2551_v48 = vsub.f32 %v181_v59, %v2508_v5  ;;  %v2553_v51 = vand.u32 4294901760, %v183_v12  ;;  %v2555_v56 = vpack.c.bf16 %v386_v62, %v379_v58  ;;  %v407_v61 = vand.u32 4294901760, %v2520_v11  ;;  %v184_v62 = vld [vmem:[%s2354_s23 + $0x38] sm:$0xff] }
  0x6b   : > { %1773 = vmatprep.subr.bf16.mxu1 %v2431_v35  ;;  %1869 = vmatprep.subr.bf16.mxu0 %v2431_v35  ;;  %v314_v63 = vand.u32 4294901760, %v2532_v31  ;;  %v2560_v54 = vsub.f32 %v182_v6, %v2542_v45  ;;  %v296_v21 = vand.u32 4294901760, %v295_v8  ;;  %v381_v27 = vand.u32 4294901760, %v380_v9 }
  0x6c   : > { %2831 = vst [vmem:[#allocation18_spill] sm:$0xff] %v2551_v48  ;;  %v414_v59 = vand.u32 4294901760, %v2529_v25  ;;  %v2568_v58 = vsub.f32 %v2395_v22, %v229_v28  ;;  %v1788_v6 = vpack.c.bf16 %v374_v14, %v367_v16  ;;  %v388_v53 = vand.u32 4294901760, %v387_v24 }
  0x6d   : > { %2832 = vst [vmem:[#allocation19_spill] sm:$0xff] %v2560_v54  ;;  %v395_v47 = vand.u32 4294901760, %v2539_v19  ;;  %v401_v46 = vsub.f32 %v2495_v1, %v400_v33  ;;  %v305_v9 = vsub.f32 %v2506_v4, %v304_v20  ;;  %v324_v57 = vand.u32 4294901760, %v2551_v48 }
  0x6e   : > { %1775 = vmatpush3.bf16.msra.mxu1 %v2431_v35  ;;  %1871 = vmatpush3.bf16.msra.mxu0 %v2431_v35  ;;  %v2579_v22 = vsub.f32 %v183_v12, %v2553_v51  ;;  %v408_v28 = vsub.f32 %v2520_v11, %v407_v61  ;;  %v315_v0 = vsub.f32 %v2532_v31, %v314_v63  ;;  %v334_v16 = vand.u32 4294901760, %v2560_v54 }
  0x6f   : > { %1777 = vmatprep.subr.bf16.mxu1 %v2464_v50  ;;  %1873 = vmatprep.subr.bf16.mxu0 %v2464_v50  ;;  %v2584_v24 = vand.u32 4294901760, %v184_v62  ;;  %v415_v14 = vsub.f32 %v2529_v25, %v414_v59  ;;  %v428_v19 = vand.u32 4294901760, %v2568_v58  ;;  %v2593_v12 = vsub.f32 %v2414_v29, %v232_v36 }
  0x70   : > { %v2598_v8 = vsub.f32 %v2416_v30, %v235_v37  ;;  %v1792_v31 = vpack.c.bf16 %v388_v53, %v381_v27  ;;  %v402_v4 = vand.u32 4294901760, %v401_v46  ;;  %v2834_v23 = vand.u32 4294901760, %v2547_v15 }
  0x71   : > { %v306_v36 = vand.u32 4294901760, %v305_v9  ;;  %v325_v35 = vsub.f32 %v2551_v48, %v324_v57  ;;  %v344_v30 = vand.u32 4294901760, %v2579_v22  ;;  %v2835_v37 = vand.u32 4294901760, %v2446_v43 }
  0x72   : > { %1779 = vmatpush3.bf16.msra.mxu1 %v2464_v50  ;;  %1875 = vmatpush3.bf16.msra.mxu0 %v2464_v50  ;;  %v2604_v50 = vsub.f32 %v184_v62, %v2584_v24  ;;  %v422_v29 = vsub.f32 %v2547_v15, %v2834_v23  ;;  %v409_v46 = vand.u32 4294901760, %v408_v28  ;;  %v316_v53 = vand.u32 4294901760, %v315_v0 }
  0x73   : > { %1781 = vmatprep.subr.bf16.mxu1 %v2484_v60  ;;  %1877 = vmatprep.subr.bf16.mxu0 %v2484_v60  ;;  %v416_v27 = vand.u32 4294901760, %v415_v14  ;;  %v429_v23 = vsub.f32 %v2568_v58, %v428_v19  ;;  %v435_v62 = vand.u32 4294901760, %v2593_v12  ;;  %v442_v9 = vand.u32 4294901760, %v2598_v8 }
  0x74   : > { %v2836_v0 = vand.u32 4294901760, %v2435_v38  ;;  %v326_v14 = vand.u32 4294901760, %v325_v35  ;;  %v423_v48 = vand.u32 4294901760, %v422_v29 }
  0x76   : > { %1783 = vmatpush3.bf16.msra.mxu1 %v2484_v60  ;;  %1879 = vmatpush3.bf16.msra.mxu0 %v2484_v60  ;;  %v2623_v28 = vsub.f32 %v2435_v38, %v2836_v0  ;;  %v1800_v38 = vpack.c.bf16 %v416_v27, %v409_v46  ;;  %v430_v0 = vand.u32 4294901760, %v429_v23 }
  0x77   : > { %1785 = vmatprep.subr.bf16.mxu1 %v2503_v3  ;;  %1881 = vmatprep.subr.bf16.mxu0 %v2503_v3 }
  0x78   : > { %v449_v35 = vand.u32 4294901760, %v2623_v28  ;;  %v1804_v46 = vpack.c.bf16 %v430_v0, %v423_v48  ;;  %v1904_v48 = vpack.c.bf16 %v442_v9, %v435_v62 }
  0x7a   : > { %1787 = vmatpush3.bf16.msra.mxu1 %v2503_v3  ;;  %1883 = vmatpush3.bf16.msra.mxu0 %v2503_v3  ;;  %v2833_v3 = vand.u32 4294901760, %v2468_v52  ;;  %v450_v23 = vsub.f32 %v2623_v28, %v449_v35 }
  0x7b   : > { %1789 = vmatprep.subr.bf16.mxu1 %v1788_v6  ;;  %1885 = vmatprep.subr.bf16.mxu0 %v2511_v7 }
  0x7c   : > { %v1892_v60 = vpack.c.bf16 %v400_v33, %v2833_v3  ;;  %v335_v3 = vsub.f32 %v2560_v54, %v334_v16  ;;  %v354_v33 = vand.u32 4294901760, %v2604_v50  ;;  %v1896_v54 = vpack.c.bf16 %v414_v59, %v407_v61 }
  0x7d   : > { %1525 = vmatmul.mubr.f32.vlgmr.msra.gmra.mrb[0].mxu1 %v296_v21  ;;  %1657 = vmatmul.mubr.f32.vlgmr.msra.gmra.mrb[0].mxu0 %v2835_v37  ;;  %v1796_v21 = vpack.c.bf16 %v402_v4, %v395_v47  ;;  %v345_v37 = vsub.f32 %v2579_v22, %v344_v30  ;;  %v2838_v61 = vand.u32 4294901760, %v2441_v41 }
  0x7e   : > { %1791 = vmatpush3.bf16.msra.mxu1 %v1788_v6  ;;  %1887 = vmatpush3.bf16.msra.mxu0 %v2511_v7  ;;  %v2837_v6 = vand.u32 4294901760, %v2437_v39  ;;  %v336_v47 = vand.u32 4294901760, %v335_v3  ;;  %v355_v4 = vsub.f32 %v2604_v50, %v354_v33 }
  0x7f   : > { %1793 = vmatprep.subr.bf16.mxu1 %v1792_v31  ;;  %1889 = vmatprep.subr.bf16.mxu0 %v2555_v56  ;;  %v346_v59 = vand.u32 4294901760, %v345_v37 }
  0x80   : > { %v2628_v7 = vsub.f32 %v2437_v39, %v2837_v6  ;;  %1527 = vmatprep.mubr.f32.mxu1 %v306_v36  ;;  %1659 = vmatprep.mubr.f32.mxu0 %v304_v20  ;;  %v436_v39 = vsub.f32 %v2593_v12, %v435_v62  ;;  %v443_v36 = vsub.f32 %v2598_v8, %v442_v9  ;;  %v356_v29 = vand.u32 4294901760, %v355_v4 }
  0x81   : > { %1528 = vmatmul.mubr.f32.gmra.mrb[2].mxu1 %v316_v53  ;;  %1660 = vmatmul.mubr.f32.gmra.mrb[2].mxu0 %v314_v63  ;;  %v2640_v63 = vsub.f32 %v2441_v41, %v2838_v61  ;;  %v2840_v53 = vand.u32 4294901760, %v2547_v15  ;;  %v1824_v4 = vpack.c.bf16 %v2456_v49, %v2448_v44  ;;  %v2842_v44 = vld [vmem:[#allocation11_spill] sm:$0xff]  ;;  %v2843_v49 = vld [vmem:[#allocation13_spill] sm:$0xff] }
  0x82   : > { %1795 = vmatpush3.bf16.msra.mxu1 %v1792_v31  ;;  %1891 = vmatpush3.bf16.msra.mxu0 %v2555_v56  ;;  %v456_v20 = vand.u32 4294901760, %v2628_v7  ;;  %v2839_v31 = vand.u32 4294901760, %v2443_v42  ;;  %v437_v27 = vand.u32 4294901760, %v436_v39  ;;  %v444_v41 = vand.u32 4294901760, %v443_v36 }
  0x83   : > { %1797 = vmatprep.subr.bf16.mxu1 %v1796_v21  ;;  %1893 = vmatprep.subr.bf16.mxu0 %v1892_v60  ;;  %v1900_v3 = vpack.c.bf16 %v428_v19, %v2840_v53 }
  0x84   : > { %v2645_v56 = vsub.f32 %v2443_v42, %v2839_v31  ;;  %1530 = vmatprep.mubr.f32.mxu1 %v326_v14  ;;  %1662 = vmatprep.mubr.f32.mxu0 %v324_v57  ;;  %v457_v42 = vsub.f32 %v2628_v7, %v456_v20  ;;  %v463_v57 = vand.u32 4294901760, %v2640_v63 }
  0x85   : > { %1531 = vmatmul.mubr.f32.gmra.mrb[4].mxu1 %v336_v47  ;;  %1663 = vmatmul.mubr.f32.gmra.mrb[4].mxu0 %v334_v16  ;;  %v451_v16 = vand.u32 4294901760, %v450_v23  ;;  %v1820_v47 = vpack.c.bf16 %v2439_v40, %v2423_v34  ;;  %v1828_v34 = vpack.c.bf16 %v2495_v1, %v2468_v52  ;;  %v2841_v40 = vld [vmem:[#allocation12_spill] sm:$0xff]  ;;  %v1844_v52 = vpack.c.bf16 %v2628_v7, %v2623_v28 }
  0x86   : > { %1799 = vmatpush3.bf16.msra.mxu1 %v1796_v21  ;;  %1895 = vmatpush3.bf16.msra.mxu0 %v1892_v60  ;;  %v470_v6 = vand.u32 4294901760, %v2645_v56  ;;  %v1808_v60 = vpack.c.bf16 %v444_v41, %v437_v27  ;;  %v458_v19 = vand.u32 4294901760, %v457_v42  ;;  %v464_v21 = vsub.f32 %v2640_v63, %v463_v57 }
  0x87   : > { %1801 = vmatprep.subr.bf16.mxu1 %v1800_v38  ;;  %1897 = vmatprep.subr.bf16.mxu0 %v1896_v54  ;;  %v1848_v1 = vpack.c.bf16 %v2645_v56, %v2640_v63 }
  0x88   : > { %1533 = vmatprep.mubr.f32.mxu1 %v346_v59  ;;  %1665 = vmatprep.mubr.f32.mxu0 %v344_v30  ;;  %v471_v14 = vsub.f32 %v2645_v56, %v470_v6  ;;  %v1812_v30 = vpack.c.bf16 %v458_v19, %v451_v16  ;;  %v1912_v37 = vpack.c.bf16 %v470_v6, %v463_v57 }
  0x89   : > { %1534 = vmatmul.mubr.f32.gmra.mrb[6].mxu1 %v356_v29  ;;  %1666 = vmatmul.mubr.f32.gmra.mrb[6].mxu0 %v354_v33  ;;  %v465_v33 = vand.u32 4294901760, %v464_v21 }
  0x8a   : > { %1803 = vmatpush3.bf16.msra.mxu1 %v1800_v38  ;;  %1899 = vmatpush3.bf16.msra.mxu0 %v1896_v54  ;;  %v1908_v54 = vpack.c.bf16 %v456_v20, %v449_v35  ;;  %v472_v62 = vand.u32 4294901760, %v471_v14 }
  0x8b   : > { %1805 = vmatprep.subr.bf16.mxu1 %v1804_v46  ;;  %1901 = vmatprep.subr.bf16.mxu0 %v1900_v3 }
  0x8c   : > { %1568 = vmatprep.mubr.f32.mxu1 %v2383_v17  ;;  %1700 = vmatprep.mubr.f32.mxu0 %v2383_v17  ;;  %v1816_v9 = vpack.c.bf16 %v472_v62, %v465_v33 }
  0x8e   : > { %1807 = vmatpush3.bf16.msra.mxu1 %v1804_v46  ;;  %1903 = vmatpush3.bf16.msra.mxu0 %v1900_v3 }
  0x8f   : > { %1809 = vmatprep.subr.bf16.mxu1 %v1808_v60  ;;  %1905 = vmatprep.subr.bf16.mxu0 %v1904_v48 }
  0x92   : > { %1811 = vmatpush3.bf16.msra.mxu1 %v1808_v60  ;;  %1907 = vmatpush3.bf16.msra.mxu0 %v1904_v48 }
  0x93   : > { %1813 = vmatprep.subr.bf16.mxu1 %v1812_v30  ;;  %1909 = vmatprep.subr.bf16.mxu0 %v1908_v54 }
  0x96   : > { %1815 = vmatpush3.bf16.msra.mxu1 %v1812_v30  ;;  %1911 = vmatpush3.bf16.msra.mxu0 %v1908_v54 }
  0x97   : > { %1817 = vmatprep.subr.bf16.mxu1 %v1816_v9  ;;  %1913 = vmatprep.subr.bf16.mxu0 %v1912_v37 }
  0x9a   : > { %1819 = vmatpush3.bf16.msra.mxu1 %v1816_v9  ;;  %1915 = vmatpush3.bf16.msra.mxu0 %v1912_v37 }
  0x9b   : > { %1821 = vmatprep.subr.bf16.mxu1 %v1820_v47  ;;  %1917 = vmatprep.subr.bf16.mxu0 %v2368_v10 }
  0x9d   : > { %1569 = vmatmul.mubr.f32.vlgmr.msra.gmra.mrb[0].mxu1 %v2419_v32  ;;  %1701 = vmatmul.mubr.f32.vlgmr.msra.gmra.mrb[0].mxu0 %v2419_v32 }
  0x9e   : > { %1823 = vmatpush3.bf16.msra.mxu1 %v1820_v47  ;;  %1919 = vmatpush3.bf16.msra.mxu0 %v2368_v10  ;;  %v1832_v10 = vpack.c.bf16 %v2529_v25, %v2520_v11  ;;  %v2846_v11 = vld [vmem:[#allocation16_spill] sm:$0xff]  ;;  %v2847_v25 = vld [vmem:[#allocation17_spill] sm:$0xff] }
  0x9f   : > { %1825 = vmatprep.subr.bf16.mxu1 %v1824_v4  ;;  %1921 = vmatprep.subr.bf16.mxu0 %v2372_v13 }
  0xa0   : > { %1571 = vmatprep.mubr.f32.mxu1 %v2472_v55  ;;  %1703 = vmatprep.mubr.f32.mxu0 %v2472_v55 }
  0xa1   : > { %1572 = vmatmul.mubr.f32.gmra.mrb[2].mxu1 %v2497_v2  ;;  %1704 = vmatmul.mubr.f32.gmra.mrb[2].mxu0 %v2497_v2 }
  0xa2   : > { %1827 = vmatpush3.bf16.msra.mxu1 %v1824_v4  ;;  %1923 = vmatpush3.bf16.msra.mxu0 %v2372_v13  ;;  %v1836_v13 = vpack.c.bf16 %v2568_v58, %v2547_v15  ;;  %v2848_v15 = vld [vmem:[#allocation18_spill] sm:$0xff]  ;;  %v2849_v58 = vld [vmem:[#allocation19_spill] sm:$0xff] }
  0xa3   : > { %1829 = vmatprep.subr.bf16.mxu1 %v1828_v34  ;;  %1925 = vmatprep.subr.bf16.mxu0 %v2389_v18 }
  0xa4   : > { %1574 = vmatprep.mubr.f32.mxu1 %v2508_v5  ;;  %1706 = vmatprep.mubr.f32.mxu0 %v2508_v5 }
  0xa5   : > { %1575 = vmatmul.mubr.f32.gmra.mrb[4].mxu1 %v2542_v45  ;;  %1707 = vmatmul.mubr.f32.gmra.mrb[4].mxu0 %v2542_v45 }
  0xa6   : > { %1831 = vmatpush3.bf16.msra.mxu1 %v1828_v34  ;;  %1927 = vmatpush3.bf16.msra.mxu0 %v2389_v18  ;;  %v1840_v18 = vpack.c.bf16 %v2598_v8, %v2593_v12 }
  0xa7   : > { %1833 = vmatprep.subr.bf16.mxu1 %v1832_v10  ;;  %1929 = vmatprep.subr.bf16.mxu0 %v2410_v26 }
  0xa8   : > { %1577 = vmatprep.mubr.f32.mxu1 %v2553_v51  ;;  %1709 = vmatprep.mubr.f32.mxu0 %v2553_v51 }
  0xa9   : > { %1578 = vmatmul.mubr.f32.gmra.mrb[6].mxu1 %v2584_v24  ;;  %1710 = vmatmul.mubr.f32.gmra.mrb[6].mxu0 %v2584_v24 }
  0xaa   : > { %1835 = vmatpush3.bf16.msra.mxu1 %v1832_v10  ;;  %1931 = vmatpush3.bf16.msra.mxu0 %v2410_v26  ;;  %v2844_v26 = vld [vmem:[#allocation14_spill] sm:$0xff] }
  0xab   : > { %1837 = vmatprep.subr.bf16.mxu1 %v1836_v13  ;;  %1933 = vmatprep.subr.bf16.mxu0 %v2841_v40 }
  0xac   : > { %1612 = vmatprep.mubr.f32.mxu1 %v2842_v44  ;;  %1744 = vmatprep.mubr.f32.mxu0 %v2383_v17  ;;  %v2845_v17 = vld [vmem:[#allocation15_spill] sm:$0xff] }
  0xae   : > { %1839 = vmatpush3.bf16.msra.mxu1 %v1836_v13  ;;  %1935 = vmatpush3.bf16.msra.mxu0 %v2841_v40 }
  0xaf   : > { %1841 = vmatprep.subr.bf16.mxu1 %v1840_v18  ;;  %1937 = vmatprep.subr.bf16.mxu0 %v2843_v49 }
  0xb2   : > { %1843 = vmatpush3.bf16.msra.mxu1 %v1840_v18  ;;  %1939 = vmatpush3.bf16.msra.mxu0 %v2843_v49 }
  0xb3   : > { %1845 = vmatprep.subr.bf16.mxu1 %v1844_v52  ;;  %1941 = vmatprep.subr.bf16.mxu0 %v2844_v26 }
  0xb6   : > { %1847 = vmatpush3.bf16.msra.mxu1 %v1844_v52  ;;  %1943 = vmatpush3.bf16.msra.mxu0 %v2844_v26 }
  0xb7   : > { %1849 = vmatprep.subr.bf16.mxu1 %v1848_v1  ;;  %1945 = vmatprep.subr.bf16.mxu0 %v2845_v17 }
  0xba   : > { %1851 = vmatpush3.bf16.msra.mxu1 %v1848_v1  ;;  %1947 = vmatpush3.bf16.msra.mxu0 %v2845_v17 }
  0xbd   : > { %1613 = vmatmul.mubr.f32.vlgmr.msra.gmra.mrb[0].mxu1 %v2446_v43  ;;  %1745 = vmatmul.mubr.f32.vlgmr.msra.gmra.mrb[0].mxu0 %v2419_v32 }
  0xbe   : > { %1615 = vmatprep.mubr.f32.mxu1 %v2846_v11  ;;  %1747 = vmatprep.mubr.f32.mxu0 %v2472_v55 }
  0xc1   : > { %1616 = vmatmul.mubr.f32.gmra.mrb[2].mxu1 %v2847_v25  ;;  %1748 = vmatmul.mubr.f32.gmra.mrb[2].mxu0 %v2497_v2 }
  0xc2   : > { %1618 = vmatprep.mubr.f32.mxu1 %v2848_v15  ;;  %1750 = vmatprep.mubr.f32.mxu0 %v2508_v5 }
  0xc5   : > { %1619 = vmatmul.mubr.f32.gmra.mrb[4].mxu1 %v2849_v58  ;;  %1751 = vmatmul.mubr.f32.gmra.mrb[4].mxu0 %v2542_v45 }
  0xc6   : > { %1621 = vmatprep.mubr.f32.mxu1 %v2579_v22  ;;  %1753 = vmatprep.mubr.f32.mxu0 %v2553_v51 }
  0xc9   : > { %1622 = vmatmul.mubr.f32.gmra.mrb[6].mxu1 %v2604_v50  ;;  %1754 = vmatmul.mubr.f32.gmra.mrb[6].mxu0 %v2584_v24 }
 0x190   : > { %v1614_v32 = vpop.f32.mrb[0].mxu1  ;;  %v1746_v43 = vpop.f32.mrb[0].mxu0 }
 0x191   : > { %v2719_v55 = vadd.f32 %v1746_v43, %v1614_v32  ;;  %v655_v2 = vpop.f32.mrb[1].mxu1  ;;  %v1097_v8 = vpop.f32.mrb[1].mxu0 }
 0x192   : > { %v1949_v12 = vadd.f32 %v1097_v8, %v655_v2 }
 0x193   : > { %v1158_v5 = vmul.f32 %v2719_v55, %v2719_v55 }
 0x194   : > { %v1143_v45 = vadd.f32 %v1949_v12, %v2719_v55  ;;  %v1157_v28 = vmul.f32 %v1949_v12, %v1949_v12  ;;  %v1617_v22 = vpop.f32.mrb[2].mxu1  ;;  %v1749_v7 = vpop.f32.mrb[2].mxu0 }
 0x195   : > { %v1950_v51 = vadd.f32 %v1749_v7, %v1617_v22  ;;  %v669_v38 = vpop.f32.mrb[3].mxu1  ;;  %v1109_v50 = vpop.f32.mrb[3].mxu0 }
 0x196   : > { %v1165_v0 = vadd.f32 %v1158_v5, %v1157_v28  ;;  %v1951_v24 = vadd.f32 %v1109_v50, %v669_v38 }
 0x197   : > { %v1160_v56 = vmul.f32 %v1950_v51, %v1950_v51 }
 0x198   : > { %v1144_v39 = vadd.f32 %v1951_v24, %v1143_v45  ;;  %v1159_v36 = vmul.f32 %v1951_v24, %v1951_v24  ;;  %v1620_v35 = vpop.f32.mrb[4].mxu1  ;;  %v1752_v20 = vpop.f32.mrb[4].mxu0 }
 0x199   : > { %v1952_v61 = vadd.f32 %v1752_v20, %v1620_v35  ;;  %v683_v63 = vpop.f32.mrb[5].mxu1  ;;  %v1121_v31 = vpop.f32.mrb[5].mxu0 }
 0x19a   : > { %v1166_v59 = vadd.f32 %v1165_v0, %v1159_v36  ;;  %v1953_v29 = vadd.f32 %v1121_v31, %v683_v63  ;;  %v1145_v46 = vadd.f32 %v1950_v51, %v1144_v39 }
 0x19b   : > { %v1162_v60 = vmul.f32 %v1952_v61, %v1952_v61 }
 0x19c   : > { %v1146_v53 = vadd.f32 %v1953_v29, %v1145_v46  ;;  %v1161_v3 = vmul.f32 %v1953_v29, %v1953_v29  ;;  %v1167_v27 = vadd.f32 %v1166_v59, %v1160_v56  ;;  %v1623_v41 = vpop.f32.mrb[6].mxu1  ;;  %v1755_v23 = vpop.f32.mrb[6].mxu0 }
 0x19d   : > { %v1954_v42 = vadd.f32 %v1755_v23, %v1623_v41  ;;  %v697_v57 = vpop.f32.mrb[7].mxu1  ;;  %v1133_v6 = vpop.f32.mrb[7].mxu0 }
 0x19e   : > { %v1168_v48 = vadd.f32 %v1167_v27, %v1161_v3  ;;  %v1955_v16 = vadd.f32 %v1133_v6, %v697_v57  ;;  %v1147_v19 = vadd.f32 %v1952_v61, %v1146_v53 }
 0x19f   : > { %v1164_v54 = vmul.f32 %v1954_v42, %v1954_v42 }
 0x1a0   : > { %v1148_v21 = vadd.f32 %v1955_v16, %v1147_v19  ;;  %v1163_v14 = vmul.f32 %v1955_v16, %v1955_v16  ;;  %v1169_v30 = vadd.f32 %v1168_v48, %v1162_v60 }
 0x1a2   : > { %v1149_v33 = vadd.f32 %v1954_v42, %v1148_v21  ;;  %v1170_v62 = vadd.f32 %v1169_v30, %v1163_v14 }
 0x1a4   : > { %v1150_v9 = vrot.slane %v1149_v33, 4  ;;  %v1171_v37 = vadd.f32 %v1170_v62, %v1164_v54 }
 0x1a6   : > { %v1151_v47 = vadd.f32 %v1150_v9, %v1149_v33  ;;  %v1172_v4 = vrot.slane %v1171_v37, 4 }
 0x1a8   : > { %v1152_v34 = vrot.slane %v1151_v47, 2  ;;  %v1173_v10 = vadd.f32 %v1172_v4, %v1171_v37 }
 0x1aa   : > { %v1153_v13 = vadd.f32 %v1152_v34, %v1151_v47  ;;  %v1174_v40 = vrot.slane %v1173_v10, 2 }
 0x1ac   : > { %v1154_v18 = vrot.slane %v1153_v13, 1  ;;  %v1175_v44 = vadd.f32 %v1174_v40, %v1173_v10 }
 0x1ae   : > { %v1155_v49 = vadd.f32 %v1154_v18, %v1153_v13  ;;  %v1176_v52 = vrot.slane %v1175_v44, 1 }
 0x1b0   : > { %v1156_v26 = vmul.f32 0.015625, %v1155_v49  ;;  %v1177_v1 = vadd.f32 %v1176_v52, %v1175_v44 }
 0x1b2   : > { %v1178_v17 = vmul.f32 0.015625, %v1177_v1  ;;  %v1179_v11 = vmul.f32 %v1156_v26, %v1156_v26  ;;  %v1183_v58 = vsub.f32 0.0, %v1156_v26 }
 0x1b4   : > { %v1180_v25 = vsub.f32 %v1178_v17, %v1179_v11 }
 0x1b6   : > { %v1181_v15 = vadd.f32 1e-05, %v1180_v25 }
 0x1b8   : > { %2049 = vrsqrt.f32 %v1181_v15 }
 0x1c2   : > { %v2050_v32 = vpop.eup %2049 }
 0x1c3   : > { %v1184_v43 = vmul.f32 %v2050_v32, %v1183_v58  ;;  %v1185_v2 = vmul.f32 %v2050_v32, %v1949_v12  ;;  %v1186_v8 = vmul.f32 %v2050_v32, %v2719_v55  ;;  %v1187_v5 = vmul.f32 %v2050_v32, %v1951_v24 }
 0x1c4   : > { %v1188_v45 = vmul.f32 %v2050_v32, %v1950_v51  ;;  %v1189_v28 = vmul.f32 %v2050_v32, %v1953_v29  ;;  %v1190_v22 = vmul.f32 %v2050_v32, %v1952_v61  ;;  %v1191_v7 = vmul.f32 %v2050_v32, %v1955_v16 }
 0x1c5   : > { %v1192_v38 = vmul.f32 %v2050_v32, %v1954_v42  ;;  %v1193_v50 = vadd.f32 %v1185_v2, %v1184_v43  ;;  %v1194_v0 = vadd.f32 %v1186_v8, %v1184_v43  ;;  %v1195_v39 = vadd.f32 %v1187_v5, %v1184_v43 }
 0x1c6   : > { %v1196_v36 = vadd.f32 %v1188_v45, %v1184_v43  ;;  %v1197_v35 = vadd.f32 %v1189_v28, %v1184_v43  ;;  %v1198_v20 = vadd.f32 %v1190_v22, %v1184_v43  ;;  %v1199_v63 = vadd.f32 %v1191_v7, %v1184_v43 }
 0x1c7   : > { %v1200_v55 = vadd.f32 %v1192_v38, %v1184_v43  ;;  %v1209_v12 = vmul.f32 0.2, %v1193_v50  ;;  %v1210_v51 = vmul.f32 0.2, %v1194_v0  ;;  %v1211_v24 = vmul.f32 0.2, %v1195_v39 }
 0x1c8   : > { %vm1207_vm0 = vcmp.ge.f32.partialorder %v1199_v63, 0.0  ;;  %v1212_v61 = vmul.f32 0.2, %v1196_v36  ;;  %v1213_v31 = vmul.f32 0.2, %v1197_v35  ;;  %vm1201_vm1 = vcmp.ge.f32.partialorder %v1193_v50, 0.0 }
 0x1c9   : > { %v1214_v56 = vmul.f32 0.2, %v1198_v20  ;;  %v1215_v59 = vmul.f32 0.2, %v1199_v63  ;;  %v1216_v29 = vmul.f32 0.2, %v1200_v55  ;;  %v1217_v46 = vsel %vm1201_vm1, %v1193_v50, %v1209_v12 }
 0x1ca   : > { %vm1202_vm2 = vcmp.ge.f32.partialorder %v1194_v0, 0.0  ;;  %vm1203_vm3 = vcmp.ge.f32.partialorder %v1195_v39, 0.0  ;;  %vm1204_vm4 = vcmp.ge.f32.partialorder %v1196_v36, 0.0  ;;  %vm1205_vm5 = vcmp.ge.f32.partialorder %v1197_v35, 0.0  ;;  %1225 = vst [vmem:[%s2728_s17] sm:$0xff] %v1217_v46 }
 0x1cb   : > { %v1223_v53 = vsel %vm1207_vm0, %v1199_v63, %v1215_v59  ;;  %vm1206_vm6 = vcmp.ge.f32.partialorder %v1198_v20, 0.0  ;;  %vm1208_vm7 = vcmp.ge.f32.partialorder %v1200_v55, 0.0  ;;  %v1218_v3 = vsel %vm1202_vm2, %v1194_v0, %v1210_v51 }
 0x1cc   : > { %1231 = vst [vmem:[%s2728_s17 + $0x30] sm:$0xff] %v1223_v53  ;;  %v1219_v27 = vsel %vm1203_vm3, %v1195_v39, %v1211_v24  ;;  %v1220_v41 = vsel %vm1204_vm4, %v1196_v36, %v1212_v61  ;;  %v1221_v23 = vsel %vm1205_vm5, %v1197_v35, %v1213_v31  ;;  %v1222_v42 = vsel %vm1206_vm6, %v1198_v20, %v1214_v56 }
 0x1cd   : > { %1226 = vst [vmem:[%s2728_s17 + $0x8] sm:$0xff] %v1218_v3  ;;  %v1224_v57 = vsel %vm1208_vm7, %v1200_v55, %v1216_v29  ;;  %1227 = vst [vmem:[%s2728_s17 + $0x10] sm:$0xff] %v1219_v27 }
 0x1ce   : > { %1228 = vst [vmem:[%s2728_s17 + $0x18] sm:$0xff] %v1220_v41  ;;  %1229 = vst [vmem:[%s2728_s17 + $0x20] sm:$0xff] %v1221_v23 }
 0x1cf   : > { %1230 = vst [vmem:[%s2728_s17 + $0x28] sm:$0xff] %v1222_v42  ;;  %1232 = vst [vmem:[%s2728_s17 + $0x38] sm:$0xff] %v1224_v57 }
 0x1d0   : > { %2122 = shalt.err (!%p2119_p7)
}
 0x1d1   : > { %s2123_s20 = scalar_lea.hbm %s2735_s27, 1024  ;;  %s2127_s25 = scalar_lea.hbm %s2790_s2, 2048 }
 0x1d2   : > { %p2124_p9 = scmp.ne.s32.totalorder %s2735_s27, %s2123_s20  ;;  %p2128_p5 = scmp.lt.u32.totalorder %s2735_s27, %s2790_s2 }
 0x1d3   : > { %p2129_p11 = scmp.lt.u32.totalorder %s2127_s25, %s2123_s20  ;;  %p2131_p4 = scmp.lt.u32.totalorder %s2123_s20, %s2735_s27 }
 0x1d4   : > { %p2125_p1 = pnand %p2124_p9, %p2297_p12 }
 0x1d5   : > { %p2130_p2 = por %p2129_p11, %p2128_p5 }
 0x1d6   : > { %p2126_p0 = pneg %p2125_p1 }
 0x1d7   : > { %p2132_p6 = por %p2131_p4, %p2130_p2 }
 0x1d9   : > { %p2133_p8 = pnand %p2132_p6, %p2126_p0 }
 0x1db   : > { %2136 = shalt.err (!%p2133_p8)
}
 0x1dc   : > { %s2186_s30 = smov 128   ;;  %s2187_s23 = smov 8  }
 0x1dd   : > { %1994 = dma.vmem_to_hbm [thread:$0]  (%p2297_p12), %s2737_s4, 1024, %s2735_s27, %s1234_s22, %s2186_s30, %s2186_s30, %s2187_s23  }
 0x1de PF: > { %s1262_s15 = sand.u32 1, %s2167_s9   ;;  %p2850_p10 = scmp.ne.s32.totalorder %s2814_s16, 0 }
 0x1df   : > { %p2851_p13 = scmp.ge.s32.totalorder %s2179_s12, 2  ;;  %s1263_s17 = scalar_lea.sflag [#allocation4], %s1262_s15 }
 0x1e1   : > { %p2005_p3 = pnand %p2851_p13, %p2850_p10 }
 0x1e3   : > { %2162 = dma.done.wait (!%p2005_p3), %s1263_s17, 1024  }
 0x1e4   : > { %2164 = vsyncadd (!%p2005_p3), %s1263_s17, 4294966272  ;;  %p16_p7 = scmp.ge.s32.totalorder %s2259_s21, 4   ;;  %s2852_s9 = smov %s2171_s10 }
 0x1e5   : > { %s2853_s10 = smov %s2175_s11  ;;  %s2854_s11 = smov %s2293_s8 }
 0x1e6   : > { %s2855_s12 = smov %s2259_s21  ;;  %18 = sbr.rel (!%p16_p7) target bundleno = 6 (0x6), region = 77 }
 0x1ed   :  { %1268 = vsyncpa [#allocation3], 1 }
 0x1ee   :  { %1270 = vsyncpa [#allocation3 + $0x1], 1 }
 0x1ef   :  { %1271 = vsyncpa [#allocation6], 1 }
 0x1f0   :  { %1272 = vsyncpa [#allocation4], 1 }
 0x1f1   :  { %1274 = vsyncpa [#allocation4 + $0x1], 1 }

</bundles_post_ra>
